<compile_context>
chip_gen: v5e
topology: v5e:2x2
jax: 0.10.0
libtpu: 0.0.40
codegen_flags: <defaults>
</compile_context>

<pallas_src>
import functools

import jax
import jax.numpy as jnp
from jax.experimental import pallas as pl
from jax.experimental.pallas import tpu as pltpu

# ----- Wideband-YOLO dimensioning / loss hyper-parameters (deterministic) ----
S = 16                    # number of 1-D grid cells
B = 2                     # boxes per cell
NUM_CLASSES = 4           # classes
D = 1 + 1 + NUM_CLASSES   # per-box vector: [x, conf, classes...]
LAMBDA_COORD = 5.0
LAMBDA_NOOBJ = 0.5
LAMBDA_CLASS = 1.0

_MAX_ROW_TILE = 512       # sublane rows per grid step (512*128 = 65536 boxes)


def _round_up(x, m):
    return ((x + m - 1) // m) * m


def _yolo_loss_kernel(pred_ref, tgt_ref, out_ref, acc_ref, *, inv_batch):
    """One row-tile of the fused YOLO loss.

    pred_ref / tgt_ref : VMEM refs of shape [D, row_tile, 128]
    out_ref            : SMEM ref [1, 1] float32 (final scalar loss)
    acc_ref            : VMEM scratch [1, 128] float32 (running lane sums)
    """
    i = pl.program_id(0)

    @pl.when(i == 0)
    def _init():
        acc_ref[...] = jnp.zeros_like(acc_ref)

    pred = pred_ref[...].astype(jnp.float32)     # [D, RT, 128]
    tgt = tgt_ref[...].astype(jnp.float32)       # [D, RT, 128]

    # Leading-axis slices are free (vreg-group selection, no relayout).
    x_p, conf_p, cls_p = pred[0], pred[1], pred[2:]
    x_t, conf_t, cls_t = tgt[0], tgt[1], tgt[2:]

    obj = (conf_t > 0.0).astype(jnp.float32)     # [RT, 128]
    noobj = 1.0 - obj

    dx = x_p - x_t
    # 1-D "IoU" proxy clamped to [0, 1]; multiply instead of divide by 1e6.
    iou = jnp.clip(1.0 - jnp.abs(dx) * 1e-6, 0.0, 1.0)
    dconf = conf_p - iou

    # Class squared-error summed over the (leading) class axis: pure VPU adds.
    cls_diff = cls_p - cls_t
    cls_sq = jnp.sum(cls_diff * cls_diff, axis=0)          # [RT, 128]

    # Fused per-box weighted loss.
    per_box = (LAMBDA_COORD * obj * (dx * dx)
               + obj * (dconf * dconf)
               + LAMBDA_NOOBJ * noobj * (conf_p * conf_p)
               + LAMBDA_CLASS * obj * cls_sq)              # [RT, 128]

    # Sublane reduce + accumulate into the resident lane vector; the expensive
    # cross-lane reduce happens only once, in the finalize step.
    acc_ref[...] += jnp.sum(per_box, axis=0, keepdims=True)   # [1, 128]

    @pl.when(i == pl.num_programs(0) - 1)
    def _finalize():
        out_ref[0, 0] = jnp.sum(acc_ref[...]) * jnp.float32(inv_batch)


def wideband_yolo_loss(pred, target):
    """pred:   [batch, S, B*(1+1+NUM_CLASSES)]
       target: [batch, S, B, (1+1+NUM_CLASSES)]
       returns scalar float32 loss (averaged over batch)."""
    batch_size = pred.shape[0]
    n_rows = batch_size * S * B

    pred2 = pred.reshape(n_rows, D)
    tgt2 = target.reshape(n_rows, D)

    # Choose the row tiling: boxes map to (sublane-row, lane) pairs after the
    # reshape below; rows must be a multiple of the row tile.
    n128 = _round_up(n_rows, 128)
    rows = n128 // 128
    if rows <= _MAX_ROW_TILE:
        row_tile = rows
        rows_padded = rows
    else:
        row_tile = _MAX_ROW_TILE
        rows_padded = _round_up(rows, _MAX_ROW_TILE)
    n_padded = rows_padded * 128
    num_tiles = rows_padded // row_tile

    pad = n_padded - n_rows
    if pad:
        # Zero padding contributes exactly 0 to the loss.
        pred2 = jnp.pad(pred2, ((0, pad), (0, 0)))
        tgt2 = jnp.pad(tgt2, ((0, pad), (0, 0)))

    # Attribute-major, fully dense slabs: [D, rows, 128].
    pred_t = jnp.transpose(pred2).reshape(D, rows_padded, 128)
    tgt_t = jnp.transpose(tgt2).reshape(D, rows_padded, 128)

    bytes_accessed = (pred_t.size * pred_t.dtype.itemsize
                      + tgt_t.size * tgt_t.dtype.itemsize + 4)
    cost = pl.CostEstimate(flops=32 * n_padded,
                           transcendentals=0,
                           bytes_accessed=bytes_accessed)

    out = pl.pallas_call(
        functools.partial(_yolo_loss_kernel, inv_batch=1.0 / batch_size),
        out_shape=jax.ShapeDtypeStruct((1, 1), jnp.float32),
        grid_spec=pltpu.PrefetchScalarGridSpec(
            num_scalar_prefetch=0,
            grid=(num_tiles,),
            in_specs=[
                pl.BlockSpec((D, row_tile, 128), lambda i: (0, i, 0)),
                pl.BlockSpec((D, row_tile, 128), lambda i: (0, i, 0)),
            ],
            out_specs=pl.BlockSpec(memory_space=pltpu.MemorySpace.SMEM),
            scratch_shapes=[pltpu.VMEM((1, 128), jnp.float32)],
        ),
        compiler_params=pltpu.CompilerParams(
            dimension_semantics=("arbitrary",)),
        cost_estimate=cost,
    )(pred_t, tgt_t)
    return out[0, 0]


def _reference_loss(pred, target):
    """Pure-JAX reference mirroring the PyTorch forward, for verification."""
    batch_size = pred.shape[0]
    pred = pred.reshape(batch_size, pred.shape[1], B, D).astype(jnp.float32)
    target = target.astype(jnp.float32)
    x_pred, conf_pred, class_pred = pred[..., 0], pred[..., 1], pred[..., 2:]
    x_tgt, conf_tgt, class_tgt = target[..., 0], target[..., 1], target[..., 2:]
    obj_mask = (conf_tgt > 0).astype(jnp.float32)
    noobj_mask = 1.0 - obj_mask
    coord_loss = LAMBDA_COORD * jnp.sum(obj_mask * (x_pred - x_tgt) ** 2)
    iou_1d = jnp.clip(1.0 - jnp.abs(x_pred - x_tgt) / 1000000.0, 0.0, 1.0)
    conf_loss_obj = jnp.sum(obj_mask * (conf_pred - iou_1d) ** 2)
    conf_loss_noobj = LAMBDA_NOOBJ * jnp.sum(noobj_mask * conf_pred ** 2)
    class_loss = LAMBDA_CLASS * jnp.sum(
        obj_mask[..., None] * (class_pred - class_tgt) ** 2)
    return (coord_loss + conf_loss_obj + conf_loss_noobj + class_loss) / batch_size


if __name__ == "__main__":
    key = jax.random.PRNGKey(0)
    k_pred, k_tgt = jax.random.split(key)

    batch = 2
    # pred: [batch, S, B*(1+1+NUM_CLASSES)]
    pred = jax.random.normal(k_pred, (batch, S, B * D), dtype=jnp.float32)
    # target: [batch, S, B, (1+1+NUM_CLASSES)]; uniform in [-1, 1] so that
    # roughly half of the conf targets are > 0 (mix of obj / noobj cells).
    target = jax.random.uniform(
        k_tgt, (batch, S, B, D), dtype=jnp.float32, minval=-1.0, maxval=1.0)

    loss = wideband_yolo_loss(pred, target)
    loss = jax.block_until_ready(loss)

    ref = jax.block_until_ready(_reference_loss(pred, target))
    assert jnp.allclose(loss, ref, rtol=1e-5, atol=1e-5), (loss, ref)

    print("KERNEL_OK")
</pallas_src>

<mosaic_0001>
module attributes {stable_mosaic.version = 11 : i64} {
  func.func @_yolo_loss_kernel(%arg0: i32, %arg1: memref<6x1x128xf32, #tpu.memory_space<vmem>>, %arg2: memref<6x1x128xf32, #tpu.memory_space<vmem>>, %arg3: memref<1x1xf32, #tpu.memory_space<smem>>, %arg4: memref<1x128xf32, #tpu.memory_space<vmem>>) attributes {dimension_semantics = [#tpu.dimension_semantics<arbitrary>], iteration_bounds = array<i64: 1>, scalar_prefetch = 0 : i64, scratch_operands = 1 : i64, tpu.core_type = #tpu.core_type<tc>, window_params = [{transform_indices = @transform_0, window_bounds = array<i64: 6, 1, 128>}, {transform_indices = @transform_1, window_bounds = array<i64: 6, 1, 128>}, {transform_indices = @transform_2, window_bounds = array<i64: 1, 1>}]} {
    %c0_i32 = arith.constant 0 : i32
    %0 = arith.cmpi eq, %arg0, %c0_i32 : i32
    %1 = arith.extui %0 : i1 to i32
    %c0_i32_0 = arith.constant 0 : i32
    %2 = arith.cmpi ne, %1, %c0_i32_0 : i32
    scf.if %2 {
      %cst_22 = arith.constant 0.000000e+00 : f32
      %59 = vector.broadcast %cst_22 : f32 to vector<1x128xf32>
      %c0_23 = arith.constant 0 : index
      %c0_24 = arith.constant 0 : index
      %60 = vector.load %arg4[%c0_23, %c0_24] : memref<1x128xf32, #tpu.memory_space<vmem>>, vector<1x128xf32>
      tpu.vector_store %arg4[%c0_23, %c0_24], %59 {strides = array<i32>} : memref<1x128xf32, #tpu.memory_space<vmem>>, vector<1x128xf32>,
    } else {
    }
    %c0 = arith.constant 0 : index
    %c0_1 = arith.constant 0 : index
    %c0_2 = arith.constant 0 : index
    %3 = vector.load %arg1[%c0, %c0_1, %c0_2] : memref<6x1x128xf32, #tpu.memory_space<vmem>>, vector<6x1x128xf32>
    %c0_3 = arith.constant 0 : index
    %c0_4 = arith.constant 0 : index
    %c0_5 = arith.constant 0 : index
    %4 = vector.load %arg2[%c0_3, %c0_4, %c0_5] : memref<6x1x128xf32, #tpu.memory_space<vmem>>, vector<6x1x128xf32>
    %5 = vector.extract_strided_slice %3 {offsets = [0, 0, 0], sizes = [1, 1, 128], strides = [1, 1, 1]} : vector<6x1x128xf32> to vector<1x1x128xf32>
    %6 = vector.shape_cast %5 : vector<1x1x128xf32> to vector<1x128xf32>
    %7 = vector.extract_strided_slice %3 {offsets = [1, 0, 0], sizes = [1, 1, 128], strides = [1, 1, 1]} : vector<6x1x128xf32> to vector<1x1x128xf32>
    %8 = vector.shape_cast %7 : vector<1x1x128xf32> to vector<1x128xf32>
    %9 = vector.extract_strided_slice %3 {offsets = [2, 0, 0], sizes = [4, 1, 128], strides = [1, 1, 1]} : vector<6x1x128xf32> to vector<4x1x128xf32>
    %10 = vector.extract_strided_slice %4 {offsets = [0, 0, 0], sizes = [1, 1, 128], strides = [1, 1, 1]} : vector<6x1x128xf32> to vector<1x1x128xf32>
    %11 = vector.shape_cast %10 : vector<1x1x128xf32> to vector<1x128xf32>
    %12 = vector.extract_strided_slice %4 {offsets = [1, 0, 0], sizes = [1, 1, 128], strides = [1, 1, 1]} : vector<6x1x128xf32> to vector<1x1x128xf32>
    %13 = vector.shape_cast %12 : vector<1x1x128xf32> to vector<1x128xf32>
    %14 = vector.extract_strided_slice %4 {offsets = [2, 0, 0], sizes = [4, 1, 128], strides = [1, 1, 1]} : vector<6x1x128xf32> to vector<4x1x128xf32>
    %cst = arith.constant 0.000000e+00 : f32
    %15 = vector.broadcast %cst : f32 to vector<1x128xf32>
    %16 = arith.cmpf ogt, %13, %15 : vector<1x128xf32>
    %17 = arith.extui %16 : vector<1x128xi1> to vector<1x128xi32>
    %18 = arith.sitofp %17 : vector<1x128xi32> to vector<1x128xf32>
    %cst_6 = arith.constant 1.000000e+00 : f32
    %19 = vector.broadcast %cst_6 : f32 to vector<1x128xf32>
    %20 = arith.subf %19, %18 : vector<1x128xf32>
    %21 = arith.subf %6, %11 : vector<1x128xf32>
    %22 = math.absf %21 : vector<1x128xf32>
    %cst_7 = arith.constant 9.99999997E-7 : f32
    %23 = vector.broadcast %cst_7 : f32 to vector<1x128xf32>
    %24 = arith.mulf %22, %23 : vector<1x128xf32>
    %cst_8 = arith.constant 1.000000e+00 : f32
    %25 = vector.broadcast %cst_8 : f32 to vector<1x128xf32>
    %26 = arith.subf %25, %24 : vector<1x128xf32>
    %cst_9 = arith.constant 0.000000e+00 : f32
    %cst_10 = arith.constant 1.000000e+00 : f32
    %27 = vector.broadcast %cst_9 : f32 to vector<1x128xf32>
    %28 = arith.maximumf %27, %26 : vector<1x128xf32>
    %29 = vector.broadcast %cst_10 : f32 to vector<1x128xf32>
    %30 = arith.minimumf %29, %28 : vector<1x128xf32>
    %31 = arith.subf %8, %30 : vector<1x128xf32>
    %32 = arith.subf %9, %14 : vector<4x1x128xf32>
    %33 = arith.mulf %32, %32 : vector<4x1x128xf32>
    %cst_11 = arith.constant dense<0.000000e+00> : vector<1x128xf32>
    %34 = vector.multi_reduction <add>, %33, %cst_11 [0] : vector<4x1x128xf32> to vector<1x128xf32>
    %cst_12 = arith.constant 5.000000e+00 : f32
    %35 = vector.broadcast %cst_12 : f32 to vector<1x128xf32>
    %36 = arith.mulf %35, %18 : vector<1x128xf32>
    %37 = arith.mulf %21, %21 : vector<1x128xf32>
    %38 = arith.mulf %36, %37 : vector<1x128xf32>
    %39 = arith.mulf %31, %31 : vector<1x128xf32>
    %40 = arith.mulf %18, %39 : vector<1x128xf32>
    %41 = arith.addf %38, %40 : vector<1x128xf32>
    %cst_13 = arith.constant 5.000000e-01 : f32
    %42 = vector.broadcast %cst_13 : f32 to vector<1x128xf32>
    %43 = arith.mulf %42, %20 : vector<1x128xf32>
    %44 = arith.mulf %8, %8 : vector<1x128xf32>
    %45 = arith.mulf %43, %44 : vector<1x128xf32>
    %46 = arith.addf %41, %45 : vector<1x128xf32>
    %cst_14 = arith.constant 1.000000e+00 : f32
    %47 = vector.broadcast %cst_14 : f32 to vector<1x128xf32>
    %48 = arith.mulf %47, %18 : vector<1x128xf32>
    %49 = arith.mulf %48, %34 : vector<1x128xf32>
    %50 = arith.addf %46, %49 : vector<1x128xf32>
    %c0_15 = arith.constant 0 : index
    %c0_16 = arith.constant 0 : index
    %51 = vector.load %arg4[%c0_15, %c0_16] : memref<1x128xf32, #tpu.memory_space<vmem>>, vector<1x128xf32>
    %cst_17 = arith.constant dense<0.000000e+00> : vector<128xf32>
    %52 = vector.multi_reduction <add>, %50, %cst_17 [0] : vector<1x128xf32> to vector<128xf32>
    %53 = vector.shape_cast %52 : vector<128xf32> to vector<1x128xf32>
    %54 = arith.addf %51, %53 : vector<1x128xf32>
    %c0_18 = arith.constant 0 : index
    %c0_19 = arith.constant 0 : index
    %55 = vector.load %arg4[%c0_18, %c0_19] : memref<1x128xf32, #tpu.memory_space<vmem>>, vector<1x128xf32>
    tpu.vector_store %arg4[%c0_18, %c0_19], %54 {strides = array<i32>} : memref<1x128xf32, #tpu.memory_space<vmem>>, vector<1x128xf32>,
    %c0_i32_20 = arith.constant 0 : i32
    %56 = arith.cmpi eq, %arg0, %c0_i32_20 : i32
    %57 = arith.extui %56 : i1 to i32
    %c0_i32_21 = arith.constant 0 : i32
    %58 = arith.cmpi ne, %57, %c0_i32_21 : i32
    scf.if %58 {
      %c0_22 = arith.constant 0 : index
      %c0_23 = arith.constant 0 : index
      %59 = vector.load %arg4[%c0_22, %c0_23] : memref<1x128xf32, #tpu.memory_space<vmem>>, vector<1x128xf32>
      %60 = vector.shape_cast %59 : vector<1x128xf32> to vector<1x1x128xf32>
      %cst_24 = arith.constant dense<0.000000e+00> : vector<1xf32>
      %61 = vector.multi_reduction <add>, %60, %cst_24 [1, 2] : vector<1x1x128xf32> to vector<1xf32>
      %62 = vector.shape_cast %61 : vector<1xf32> to vector<1x1x1xf32>
      %63 = vector.extract %62[0, 0, 0] : f32 from vector<1x1x1xf32>
      %cst_25 = arith.constant 5.000000e-01 : f32
      %64 = arith.mulf %63, %cst_25 : f32
      %c0_26 = arith.constant 0 : index
      %c0_27 = arith.constant 0 : index
      %65 = memref.load %arg3[%c0_26, %c0_27] : memref<1x1xf32, #tpu.memory_space<smem>>
      memref.store %64, %arg3[%c0_26, %c0_27] : memref<1x1xf32, #tpu.memory_space<smem>>
    } else {
    }
    return
  }
  func.func @transform_0(%arg0: i32) -> (i32, i32, i32) {
    %c0_i32 = arith.constant 0 : i32
    %c0_i32_0 = arith.constant 0 : i32
    %c0_i32_1 = arith.constant 0 : i32
    return %c0_i32, %arg0, %c0_i32_0 : i32, i32, i32
  }
  func.func @transform_1(%arg0: i32) -> (i32, i32, i32) {
    %c0_i32 = arith.constant 0 : i32
    %c0_i32_0 = arith.constant 0 : i32
    %c0_i32_1 = arith.constant 0 : i32
    return %c0_i32, %arg0, %c0_i32_0 : i32, i32, i32
  }
  func.func @transform_2(%arg0: i32) -> (i32, i32) {
    %c0_i32 = arith.constant 0 : i32
    %c0_i32_0 = arith.constant 0 : i32
    %c0_i32_1 = arith.constant 0 : i32
    return %c0_i32, %c0_i32_0 : i32, i32
  }
}

</mosaic_0001>

<bundles_post_ra>
// kernel: tpu_custom_call.1
= control target key start
LH: loop header
LB: loop body
LE: loop exit
PB: predicated region body
PF: predicated region fallthrough
CT: control target
= control target key end

     0   :  { %7 = vsyncpa [#allocation4], 0  ;;  %s248_s0 = inlined_call_operand.hbm [shape: f32[6,1,128], index: 0, kind: input, shape index: {}]   ;;  %s249_s1 = inlined_call_operand.hbm [shape: f32[6,1,128], index: 1, kind: input, shape index: {}]   ;;  %s250_s2 = inlined_call_operand.hbm [shape: f32[1,1], index: 2, kind: output, shape index: {}]  }
   0x1   :  { %8 = vsyncpa [#allocation7], 0 }
   0x2   :  { %9 = vsyncpa [#allocation5], 0  ;;  %s14_s11 = sshll.u32 %s248_s0, 4  ;;  %s213_s12 = smov [#allocation3]   ;;  %s15_s11 = int_to_ptr.hbm [resolvable:$true] %s14_s11 }
   0x3   :  { %s16_s13 = sshll.u32 %s213_s12, 4  ;;  %s27_s16 = sshll.u32 %s249_s1, 4  ;;  %s17_s13 = int_to_ptr.vmem [resolvable:$true] %s16_s13  ;;  %s28_s16 = int_to_ptr.hbm [resolvable:$true] %s27_s16 }
   0x4   :  { %s214_s17 = smov 16   ;;  %s215_s18 = smov 1  }
   0x5   :  { %22 = dma.hbm_to_vmem [thread:$0]  %s15_s11, 96, %s17_s13, [#allocation4], %s214_s17, %s214_s17, %s215_s18  }
   0x6   :  { %s216_s19 = smov [#allocation6]  }
   0x7   :  { %s29_s20 = sshll.u32 %s216_s19, 4  ;;  %s30_s20 = int_to_ptr.vmem [resolvable:$true] %s29_s20 }
   0x8   :  { %35 = dma.hbm_to_vmem [thread:$0]  %s28_s16, 96, %s30_s20, [#allocation7], %s214_s17, %s214_s17, %s215_s18  }
   0x9   :  { %207 = dma.done.wait [#allocation4], 96  }
   0xa   :  { %208 = vsyncadd [#allocation4], 4294967200 }
   0xb   :  { %209 = dma.done.wait [#allocation7], 96  }
   0xc   :  { %210 = vsyncadd [#allocation7], 4294967200  ;;  %v217_v0 = vmov 0.0   ;;  %v49_v1 = vld [vmem:[#allocation3] sm:$0x1]  ;;  %vm80_vm0 = vcmask 1040384  }
   0xd   :  { %48 = vst [vmem:[#allocation2] sm:$0x1] %v217_v0  ;;  %v51_v2 = vld [vmem:[#allocation3 + $0x2] sm:$0x1]  ;;  %v52_v3 = vld [vmem:[#allocation3 + $0x3] sm:$0x1] }
   0xe   :  { %v53_v4 = vld [vmem:[#allocation3 + $0x4] sm:$0x1]  ;;  %v54_v5 = vld [vmem:[#allocation3 + $0x5] sm:$0x1]  ;;  %v55_v6 = vld [vmem:[#allocation6] sm:$0x1] }
   0xf   :  { %v56_v7 = vld [vmem:[#allocation6 + $0x1] sm:$0x1]  ;;  %v57_v8 = vld [vmem:[#allocation6 + $0x2] sm:$0x1]  ;;  %v58_v9 = vld [vmem:[#allocation6 + $0x3] sm:$0x1]  ;;  %v65_v12 = vsub.f32 %v49_v1, %v55_v6 }
  0x10   :  { %v59_v10 = vld [vmem:[#allocation6 + $0x4] sm:$0x1]  ;;  %v60_v11 = vld [vmem:[#allocation6 + $0x5] sm:$0x1]  ;;  %v72_v13 = vsub.f32 %v51_v2, %v57_v8  ;;  %v73_v14 = vsub.f32 %v52_v3, %v58_v9  ;;  %vm61_vm1 = vcmp.gt.f32.partialorder %v56_v7, 0.0  ;;  %s126_s21 = sshll.u32 %s250_s2, 4  ;;  %s127_s21 = int_to_ptr.hbm [resolvable:$true] %s126_s21 }
  0x11   :  { %v74_v15 = vsub.f32 %v53_v4, %v59_v10  ;;  %v66_v16 = vand.u32 2147483647, %v65_v12  ;;  %v75_v18 = vsub.f32 %v54_v5, %v60_v11  ;;  %v138_v23 = vsel %vm61_vm1, 1.0, %v217_v0  ;;  %v50_v31 = vld [vmem:[#allocation3 + $0x1] sm:$0x1]  ;;  %s218_s24 = smov [#allocation8]  }
  0x12   :  { %v76_v17 = vmul.f32 %v72_v13, %v72_v13  ;;  %v77_v19 = vmul.f32 %v73_v14, %v73_v14  ;;  %v64_v29 = vsub.f32 1.0, %v138_v23  ;;  %v88_v34 = vmul.f32 5.0, %v138_v23 }
  0x13   :  { %v78_v20 = vmul.f32 %v74_v15, %v74_v15  ;;  %v67_v21 = vmul.f32 1e-06, %v66_v16  ;;  %v79_v27 = vmul.f32 %v75_v18, %v75_v18  ;;  %v89_v35 = vmul.f32 %v65_v12, %v65_v12 }
  0x14   :  { %v81_v22 = vsel %vm80_vm0, %v76_v17, 0.0  ;;  %v82_v24 = vsel %vm80_vm0, %v77_v19, 0.0  ;;  %v94_v38 = vmul.f32 0.5, %v64_v29  ;;  %v95_v39 = vmul.f32 %v50_v31, %v50_v31  ;;  %v100_v48 = vld [vmem:[#allocation2] sm:$0x1] }
  0x15   :  { %v68_v25 = vsub.f32 1.0, %v67_v21  ;;  %v83_v26 = vadd.f32 %v82_v24, %v81_v22  ;;  %v84_v28 = vsel %vm80_vm0, %v78_v20, 0.0  ;;  %v86_v36 = vsel %vm80_vm0, %v79_v27, 0.0 }
  0x16   :  { %v90_v41 = vmul.f32 %v89_v35, %v88_v34  ;;  %v96_v44 = vmul.f32 %v95_v39, %v94_v38 }
  0x17   :  { %v69_v30 = vmax.f32 %v68_v25, 0.0  ;;  %v85_v33 = vadd.f32 %v84_v28, %v83_v26 }
  0x19   :  { %v70_v32 = vmin.f32 %v69_v30, 1.0  ;;  %v87_v40 = vadd.f32 %v86_v36, %v85_v33 }
  0x1b   :  { %v71_v37 = vsub.f32 %v50_v31, %v70_v32  ;;  %v98_v46 = vmul.f32 %v138_v23, %v87_v40 }
  0x1d   :  { %v91_v42 = vmul.f32 %v71_v37, %v71_v37 }
  0x1f   :  { %v92_v43 = vmul.f32 %v138_v23, %v91_v42 }
  0x21   :  { %v93_v45 = vadd.f32 %v92_v43, %v90_v41 }
  0x23   :  { %v97_v47 = vadd.f32 %v96_v44, %v93_v45 }
  0x25   :  { %v99_v49 = vadd.f32 %v98_v46, %v97_v47 }
  0x27   :  { %v102_v50 = vadd.f32 %v100_v48, %v99_v49 }
  0x29   :  { %103 = vst [vmem:[#allocation2] sm:$0x1] %v102_v50 }
  0x30   :  { %v107_v51 = vld [vmem:[#allocation2] sm:$0x1] }
  0x31   :  { %v108_v52 = vsel %vm80_vm0, %v107_v51, 0.0 }
  0x32   :  { %109 = vadd.xlane.f32.xlu0 %v108_v52 }
  0xa5   :  { %v110_v53 = vpop.xlane.xlu0 %109 }
  0xa6   :  { %v111_v54 = vrot.slane %v110_v53, 4 }
  0xa8   :  { %v112_v55 = vadd.f32 %v111_v54, %v110_v53 }
  0xaa   :  { %v113_v56 = vrot.slane %v112_v55, 2 }
  0xac   :  { %v114_v57 = vadd.f32 %v113_v56, %v112_v55 }
  0xae   :  { %v115_v58 = vrot.slane %v114_v57, 1 }
  0xb0   :  { %v116_v59 = vadd.f32 %v115_v58, %v114_v57 }
  0xb2   :  { %139 = vpush %v116_v59 }
  0xe3   :  { %s140_s22 = spop %139 }
  0xe4   :  { %s118_s23 = smul.f32 0.5, %s140_s22 }
  0xe6   :  { %120 = sst [smem:[#allocation8]] %s118_s23 }
  0xe7   :  { %129 = dma.smem_to_hbm %s218_s24, 16, %s127_s21, [#allocation5]  }
  0xe8   :  { %211 = dma.done.wait [#allocation5], 16  }
  0xe9   :  { %212 = vsyncadd [#allocation5], 4294967280 }
  0xea   :  { %134 = sfence }
  0xeb   :  { %135 = vsyncpa [#allocation4], 1 }
  0xec   :  { %136 = vsyncpa [#allocation7], 1 }
  0xed   :  { %137 = vsyncpa [#allocation5], 1 }

</bundles_post_ra>
